<compile_context>
chip_gen: v7x
topology: tpu7x:2x2x1
jax: 0.10.0
libtpu: 0.0.40
codegen_flags: <defaults>
</compile_context>

<pallas_src>
import math

import jax
import jax.numpy as jnp
from jax.experimental import pallas as pl
from jax.experimental.pallas import tpu as pltpu


def _diag_mul_kernel(d_ref, x_ref, o_ref):
    # Hot path: exactly one elementwise multiply per VMEM tile. Nothing else.
    o_ref[...] = d_ref[...] * x_ref[...]


def _generation_config():
    """Per-TPU-generation tiling knobs (block bytes, VMEM cap, core sharding)."""
    kind = ""
    try:
        dev = jax.devices()[0]
        if dev.platform == "tpu":
            kind = dev.device_kind.lower()
    except Exception:
        pass
    if "7" in kind:
        # v7x: 2 TensorCores, 64 MiB VMEM/TC, ~3.2 TB/s. Moderate blocks,
        # shard the grid axis across both cores.
        return {"block_bytes": 4 << 20, "vmem_cap": 48 << 20, "core_parallel": True}
    if "v6" in kind or "6e" in kind:
        # v6e: 1 TC, 128 MiB VMEM, ~1.4 TB/s. Big blocks amortize per-step cost.
        return {"block_bytes": 8 << 20, "vmem_cap": 96 << 20, "core_parallel": False}
    if "v5e" in kind or "5 lite" in kind or "v5lite" in kind:
        # v5e: 1 TC, ~0.82 TB/s. 2 MiB blocks already sit on the roofline;
        # keep an explicit VMEM limit (default scoped VMEM is only 16 MiB).
        return {"block_bytes": 2 << 20, "vmem_cap": 64 << 20, "core_parallel": False}
    # v4 / v5p / unknown: conservative defaults ("parallel" still shards megacore).
    return {"block_bytes": 4 << 20, "vmem_cap": 48 << 20, "core_parallel": False}


def diagonal_linear_operator_forward(diagonal_vector, x, *, donate_x=False):
    """Computes diagonal_vector * x with a Pallas TPU kernel.

    Both inputs must share shape [B, C, *spatial] and (real) dtype, matching
    the module whose diagonal_vector has the full input shape. Returns an
    array of the same shape/dtype.
    """
    assert diagonal_vector.shape == x.shape, "diag and x must share a shape"
    assert diagonal_vector.dtype == x.dtype, "diag and x must share a dtype"

    orig_shape = x.shape
    n = math.prod(orig_shape) if orig_shape else 1
    itemsize = jnp.dtype(x.dtype).itemsize
    # Sub-32-bit dtypes pack along sublanes.
    sublane = {4: 8, 2: 16, 1: 32}.get(itemsize, 8)

    d_flat = diagonal_vector.reshape(-1)
    x_flat = x.reshape(-1)

    # Lane width: largest multiple of 128 (up to 1024) dividing n -> free
    # reshape, no tail. Otherwise lane = 128 and only the sub-128 remainder
    # is handled outside the kernel.
    lane = 128
    for cand in (1024, 512, 256, 128):
        if n % cand == 0:
            lane = cand
            break
    n_bulk = (n // lane) * lane

    if n_bulk == 0:
        # Cannot fill even a single 128-lane row: plain fused multiply.
        # (Callers may also route tiny tensors (<~256 KiB) here directly to
        # skip fixed pallas_call overhead.)
        return (d_flat * x_flat).reshape(orig_shape)

    cfg = _generation_config()
    rows = n_bulk // lane
    bytes_per_row = lane * itemsize

    if rows < sublane:
        # Tiny input: single block covering the whole slab (block dims equal
        # to the full array dims are always legal).
        row_tile = rows
    else:
        rows_floor = (rows // sublane) * sublane
        row_tile = max(sublane,
                       (cfg["block_bytes"] // bytes_per_row) // sublane * sublane)
        row_tile = min(row_tile, rows_floor)
        if cfg["core_parallel"] and rows >= 2 * sublane:
            # v7x: guarantee >= 2 grid steps so both TensorCores get rows.
            row_tile = min(row_tile, pl.cdiv(pl.cdiv(rows, 2), sublane) * sublane)
        row_tile = max(sublane, row_tile)

    grid_n = pl.cdiv(rows, row_tile)  # partial last block is handled by Pallas

    d2 = (d_flat if n_bulk == n else d_flat[:n_bulk]).reshape(rows, lane)
    x2 = (x_flat if n_bulk == n else x_flat[:n_bulk]).reshape(rows, lane)

    # VMEM budget: 3 streams x 2 pipeline buffers x block_bytes + headroom,
    # capped per generation.
    block_bytes = row_tile * lane * itemsize
    vmem_limit = int(min(cfg["vmem_cap"],
                         max(32 << 20, 3 * 2 * block_bytes + (4 << 20))))

    dim_sem = (pltpu.CORE_PARALLEL,) if cfg["core_parallel"] else ("parallel",)

    blk = (row_tile, lane)
    idx = lambda i: (i, 0)

    call_kwargs = {}
    if donate_x:
        # No scalar prefetch, so x2 is input index 1; output 0 reuses its HBM
        # buffer (only safe if the caller treats x as consumed).
        call_kwargs["input_output_aliases"] = {1: 0}

    out2 = pl.pallas_call(
        _diag_mul_kernel,
        out_shape=jax.ShapeDtypeStruct((rows, lane), x.dtype),
        grid_spec=pltpu.PrefetchScalarGridSpec(
            num_scalar_prefetch=0,
            grid=(grid_n,),
            in_specs=[
                pl.BlockSpec(blk, idx),
                pl.BlockSpec(blk, idx),
            ],
            out_specs=pl.BlockSpec(blk, idx),
        ),
        compiler_params=pltpu.CompilerParams(
            dimension_semantics=dim_sem,
            vmem_limit_bytes=vmem_limit,
        ),
        cost_estimate=pl.CostEstimate(
            flops=n_bulk,
            transcendentals=0,
            bytes_accessed=3 * n_bulk * itemsize,
        ),
        **call_kwargs,
    )(d2, x2)

    out_flat = out2.reshape(-1)
    if n_bulk != n:
        # Sub-128-element remainder: tiny fused jnp multiply.
        tail = d_flat[n_bulk:] * x_flat[n_bulk:]
        out_flat = jnp.concatenate([out_flat, tail])
    return out_flat.reshape(orig_shape)


if __name__ == "__main__":
    # Deterministic small example consistent with [batch, channel, H, W].
    B, C, H, W = 2, 4, 16, 16
    key = jax.random.PRNGKey(0)
    k_d, k_x = jax.random.split(key)

    # "Parameter": the diagonal vector (full [batch, channel, H, W] shape,
    # like the module's diagonal_vector argument). Deterministic init.
    diagonal_vector = jax.random.normal(k_d, (B, C, H, W), dtype=jnp.float32)
    x = jax.random.normal(k_x, (B, C, H, W), dtype=jnp.float32)

    out = jax.block_until_ready(diagonal_linear_operator_forward(diagonal_vector, x))

    ref = diagonal_vector * x
    assert out.shape == ref.shape and out.dtype == ref.dtype
    assert jnp.allclose(out, ref, atol=1e-6, rtol=1e-6)

    # Non-128-divisible shape exercises the partial-last-block + tail path
    # (no input padding, no output slicing).
    k_d2, k_x2 = jax.random.split(k_x)
    d_big = jax.random.normal(k_d2, (3, 5, 100, 130), dtype=jnp.float32)
    x_big = jax.random.normal(k_x2, (3, 5, 100, 130), dtype=jnp.float32)
    out_big = jax.block_until_ready(diagonal_linear_operator_forward(d_big, x_big))
    assert jnp.allclose(out_big, d_big * x_big, atol=1e-6, rtol=1e-6)

    # bf16 covers the packed-sublane (16-row) path.
    d_bf = jax.random.normal(k_d2, (2, 4, 32, 128), dtype=jnp.bfloat16)
    x_bf = jax.random.normal(k_x2, (2, 4, 32, 128), dtype=jnp.bfloat16)
    out_bf = jax.block_until_ready(diagonal_linear_operator_forward(d_bf, x_bf))
    assert jnp.allclose(out_bf.astype(jnp.float32),
                        (d_bf * x_bf).astype(jnp.float32), atol=1e-2, rtol=1e-2)

    # TODO(synk): complex dtypes (conjugate()/conjugate_transpose()/inverse()
    # paths of the module) are not supported by the Pallas TPU multiply kernel;
    # only the real-valued forward() is implemented here.
    print("KERNEL_OK")
</pallas_src>

<mosaic_0001>
module attributes {stable_mosaic.version = 11 : i64} {
  func.func @_diag_mul_kernel(%arg0: i32, %arg1: memref<2x1024xf32, #tpu.memory_space<vmem>>, %arg2: memref<2x1024xf32, #tpu.memory_space<vmem>>, %arg3: memref<2x1024xf32, #tpu.memory_space<vmem>>) attributes {dimension_semantics = [#tpu.dimension_semantics<parallel>], iteration_bounds = array<i64: 1>, scalar_prefetch = 0 : i64, scratch_operands = 0 : i64, tpu.core_type = #tpu.core_type<tc>, window_params = [{transform_indices = @transform_0, window_bounds = array<i64: 2, 1024>}, {transform_indices = @transform_1, window_bounds = array<i64: 2, 1024>}, {transform_indices = @transform_2, window_bounds = array<i64: 2, 1024>}]} {
    %c0 = arith.constant 0 : index
    %c0_0 = arith.constant 0 : index
    %0 = vector.load %arg1[%c0, %c0_0] : memref<2x1024xf32, #tpu.memory_space<vmem>>, vector<2x1024xf32>
    %c0_1 = arith.constant 0 : index
    %c0_2 = arith.constant 0 : index
    %1 = vector.load %arg2[%c0_1, %c0_2] : memref<2x1024xf32, #tpu.memory_space<vmem>>, vector<2x1024xf32>
    %2 = arith.mulf %0, %1 : vector<2x1024xf32>
    %c0_3 = arith.constant 0 : index
    %c0_4 = arith.constant 0 : index
    %3 = vector.load %arg3[%c0_3, %c0_4] : memref<2x1024xf32, #tpu.memory_space<vmem>>, vector<2x1024xf32>
    tpu.vector_store %arg3[%c0_3, %c0_4], %2 {strides = array<i32>} : memref<2x1024xf32, #tpu.memory_space<vmem>>, vector<2x1024xf32>,
    return
  }
  func.func @transform_0(%arg0: i32) -> (i32, i32) {
    %c0_i32 = arith.constant 0 : i32
    %c0_i32_0 = arith.constant 0 : i32
    return %arg0, %c0_i32 : i32, i32
  }
  func.func @transform_1(%arg0: i32) -> (i32, i32) {
    %c0_i32 = arith.constant 0 : i32
    %c0_i32_0 = arith.constant 0 : i32
    return %arg0, %c0_i32 : i32, i32
  }
  func.func @transform_2(%arg0: i32) -> (i32, i32) {
    %c0_i32 = arith.constant 0 : i32
    %c0_i32_0 = arith.constant 0 : i32
    return %arg0, %c0_i32 : i32, i32
  }
}

</mosaic_0001>

<bundles_post_ra>
// kernel: tpu_custom_call.1
= control target key start
LH: loop header
LB: loop body
LE: loop exit
PB: predicated region body
PF: predicated region fallthrough
CT: control target
= control target key end

     0   :  { %7 = vsyncpa [#allocation3], 0  ;;  %s189_s0 = inlined_call_operand.hbm [shape: f32[2,1024], index: 0, kind: input, shape index: {}]   ;;  %s190_s1 = inlined_call_operand.hbm [shape: f32[2,1024], index: 1, kind: input, shape index: {}]   ;;  %s191_s2 = inlined_call_operand.hbm [shape: f32[2,1024], index: 2, kind: output, shape index: {}]  }
   0x1   :  { %8 = vsyncpa [#allocation6], 0 }
   0x2   :  { %9 = vsyncpa [#allocation4], 0  ;;  %s135_s9 = smov [#allocation2]   ;;  %s136_s11 = smov [#allocation5]  }
   0x3   :  { %s16_s10 = sshll.u32 %s135_s9, 4  ;;  %s26_s12 = sshll.u32 %s136_s11, 4  ;;  %s17_s10 = int_to_ptr.vmem [resolvable:$true] %s16_s10  ;;  %s27_s12 = int_to_ptr.vmem [resolvable:$true] %s26_s12 }
   0x4   :  { %s63_s15 = scalar_lea.hbm %s189_s0, 256 }
   0x5   :  { %p64_p0 = scmp.ne.s32.totalorder %s189_s0, %s63_s15  ;;  %p67_p1 = scmp.lt.u32.totalorder %s63_s15, %s189_s0 }
   0x7   :  { %p69_p2 = pnand %p67_p1, %p64_p0 }
   0x9   :  { %72 = shalt.err (!%p69_p2)
}
   0xa   :  { %s73_s20 = scalar_lea.vmem %s17_s10, 256  ;;  %p78_p4 = scmp.lt.s32.totalorder %s17_s10, %s17_s10 }
   0xb   :  { %p74_p3 = scmp.ne.s32.totalorder %s17_s10, %s73_s20  ;;  %p79_p5 = scmp.lt.s32.totalorder %s73_s20, %s73_s20 }
   0xd   :  { %p80_p6 = por %p79_p5, %p78_p4 }
   0xf   :  { %p81_p7 = pnand %p80_p6, %p74_p3 }
  0x11   :  { %84 = shalt.err (!%p81_p7)
}
  0x12   :  { %19 = dma.hbm_to_vmem [thread:$0]  %s189_s0, 256, %s17_s10, [#allocation3]  }
  0x13   :  { %s85_s25 = scalar_lea.hbm %s190_s1, 256 }
  0x14   :  { %p86_p8 = scmp.ne.s32.totalorder %s190_s1, %s85_s25  ;;  %p89_p9 = scmp.lt.u32.totalorder %s85_s25, %s190_s1 }
  0x16   :  { %p91_p10 = pnand %p89_p9, %p86_p8 }
  0x18   :  { %94 = shalt.err (!%p91_p10)
}
  0x19   :  { %s95_s30 = scalar_lea.vmem %s27_s12, 256  ;;  %p100_p12 = scmp.lt.s32.totalorder %s27_s12, %s27_s12 }
  0x1a   :  { %p96_p11 = scmp.ne.s32.totalorder %s27_s12, %s95_s30  ;;  %p101_p13 = scmp.lt.s32.totalorder %s95_s30, %s95_s30 }
  0x1c   :  { %p102_p0 = por %p101_p13, %p100_p12 }
  0x1e   :  { %p103_p1 = pnand %p102_p0, %p96_p11 }
  0x20   :  { %106 = shalt.err (!%p103_p1)
}
  0x21   :  { %29 = dma.hbm_to_vmem [thread:$0]  %s190_s1, 256, %s27_s12, [#allocation6]  }
  0x22   :  { %129 = dma.done.wait [#allocation3], 256  }
  0x23   :  { %130 = vsyncadd [#allocation3], 4294967040 }
  0x24   :  { %131 = dma.done.wait [#allocation6], 256  }
  0x25   :  { %132 = vsyncadd [#allocation6], 4294967040  ;;  %s137_s4 = smov [#allocation7]   ;;  %v36_v0 = vld [vmem:[#allocation2] sm:$0xff]  ;;  %v38_v1 = vld [vmem:[#allocation5] sm:$0xff] }
  0x26   :  { %s50_s5 = sshll.u32 %s137_s4, 4  ;;  %v37_v2 = vld [vmem:[#allocation2 + $0x8] sm:$0xff]  ;;  %v40_v3 = vmul.f32 %v38_v1, %v36_v0  ;;  %v39_v4 = vld [vmem:[#allocation5 + $0x8] sm:$0xff]  ;;  %s51_s5 = int_to_ptr.vmem [resolvable:$true] %s50_s5 }
  0x27   :  { %v41_v5 = vmul.f32 %v39_v4, %v37_v2  ;;  %s107_s6 = scalar_lea.vmem %s51_s5, 256  ;;  %p112_p3 = scmp.lt.s32.totalorder %s51_s5, %s51_s5 }
  0x28   :  { %42 = vst [vmem:[#allocation7] sm:$0xff] %v40_v3  ;;  %p108_p2 = scmp.ne.s32.totalorder %s51_s5, %s107_s6  ;;  %p113_p4 = scmp.lt.s32.totalorder %s107_s6, %s107_s6 }
  0x29   :  { %43 = vst [vmem:[#allocation7 + $0x8] sm:$0xff] %v41_v5 }
  0x2a   :  { %p114_p5 = por %p113_p4, %p112_p3 }
  0x2c   :  { %p115_p6 = pnand %p114_p5, %p108_p2 }
  0x2e   :  { %118 = shalt.err (!%p115_p6)
}
  0x2f   :  { %s119_s8 = scalar_lea.hbm %s191_s2, 256 }
  0x30   :  { %p120_p7 = scmp.ne.s32.totalorder %s191_s2, %s119_s8  ;;  %p123_p8 = scmp.lt.u32.totalorder %s119_s8, %s191_s2 }
  0x32   :  { %p125_p9 = pnand %p123_p8, %p120_p7 }
  0x34   :  { %128 = shalt.err (!%p125_p9)
}
  0x35   :  { %53 = dma.vmem_to_hbm [thread:$0]  %s51_s5, 256, %s191_s2, [#allocation4]  }
  0x36   :  { %133 = dma.done.wait [#allocation4], 256  }
  0x37   :  { %134 = vsyncadd [#allocation4], 4294967040 }
  0x38   :  { %57 = vsyncpa [#allocation3], 1 }
  0x39   :  { %58 = vsyncpa [#allocation6], 1 }
  0x3a   :  { %59 = vsyncpa [#allocation4], 1 }

</bundles_post_ra>
